<compile_context>
chip_gen: v5e
topology: v5e:2x2
jax: 0.10.0
libtpu: 0.0.40
codegen_flags: <defaults>
</compile_context>

<pallas_src>
import functools

import jax
import jax.numpy as jnp
from jax.experimental import pallas as pl
from jax.experimental.pallas import tpu as pltpu

LANES = 128
SUBLANES = 8


def _round_up(x: int, m: int) -> int:
    return ((x + m - 1) // m) * m


def _adda_loss_kernel(src_ref, tgt_ref, out_ref, acc_src, acc_tgt, *,
                      n_src, n_tgt, tile_b):
    # src_ref: (tile_b, Cs)   tgt_ref: (tile_b, Ct)   out_ref: (8, 128)
    # acc_src: (8, Cs) f32    acc_tgt: (8, Ct) f32
    i = pl.program_id(0)

    @pl.when(i == 0)
    def _init():
        acc_src[...] = jnp.zeros_like(acc_src)
        acc_tgt[...] = jnp.zeros_like(acc_tgt)

    # Global row index of every sublane-row in this tile (2-D iota for TPU).
    rows = i * tile_b + jax.lax.broadcasted_iota(jnp.int32, (tile_b, 1), 0)

    src = src_ref[...].astype(jnp.float32)
    tgt = tgt_ref[...].astype(jnp.float32)

    # Rows past the true batch size (block padding / clamped tiles) -> 1.0, which
    # is log-neutral.  Masking happens BEFORE the log so garbage never reaches it.
    src = jnp.where(rows < n_src, src, 1.0)
    tgt = jnp.where(rows < n_tgt, tgt, 1.0)

    cs = src.shape[-1]
    ct = tgt.shape[-1]
    # vreg-aligned reshape: groups of 8 rows == one vreg row-group, so the
    # sum(axis=0) is pure elementwise VPU adds (no per-tile cross-lane reduce,
    # no full-tile scratch read-modify-write).
    acc_src[...] += jnp.log(src).reshape(tile_b // SUBLANES, SUBLANES, cs).sum(axis=0)
    acc_tgt[...] += jnp.log(tgt).reshape(tile_b // SUBLANES, SUBLANES, ct).sum(axis=0)

    @pl.when(i == pl.num_programs(0) - 1)
    def _finalize():
        s_src = jnp.sum(acc_src[:, 0:1])
        s_tgt = jnp.sum(acc_tgt[:, 0:1]) + jnp.sum(acc_tgt[:, 1:2])
        loss = -(s_src * (1.0 / n_src) + s_tgt * (1.0 / n_tgt))
        out_ref[...] = jnp.full(out_ref.shape, loss, dtype=out_ref.dtype)


def adda_loss_pallas(source: jax.Array, target: jax.Array, *, tile_rows: int = 4096) -> jax.Array:
    """Pallas implementation of ADDALoss.forward(source, target)."""
    Bs, Cs = source.shape
    Bt, Ct = target.shape
    assert Cs >= 1 and Ct >= 2, "source needs >=1 column, target needs >=2 columns"

    dtype = jnp.promote_types(source.dtype, target.dtype)
    itemsize = jnp.dtype(dtype).itemsize
    if itemsize == 4:
        sub = SUBLANES
    elif itemsize == 2:
        sub = 2 * SUBLANES          # bf16/f16 sublane-tiling minimum is (16, 128)
    else:
        dtype = jnp.dtype(jnp.float32)
        itemsize, sub = 4, SUBLANES
    source = source.astype(dtype)
    target = target.astype(dtype)

    # Row tile: multiple of the dtype sublane minimum, capped so a single block
    # of the widest input stays around ~2 MiB (double-buffered inputs + tiny
    # accumulators remain far under scoped VMEM on v5e / v6e / v7x).
    n_max = max(Bs, Bt)
    byte_cap = (2 << 20) // (max(Cs, Ct) * itemsize)
    cap = max(sub, (byte_cap // sub) * sub)
    tile_b = min(_round_up(tile_rows, sub), cap, _round_up(n_max, sub))
    tile_b = max(tile_b, sub)

    nb_src = pl.cdiv(Bs, tile_b)
    nb_tgt = pl.cdiv(Bt, tile_b)
    num_tiles = max(nb_src, nb_tgt)

    kernel = functools.partial(_adda_loss_kernel, n_src=Bs, n_tgt=Bt, tile_b=tile_b)

    cost = pl.CostEstimate(
        flops=2 * num_tiles * tile_b * (Cs + Ct),
        transcendentals=num_tiles * tile_b * (Cs + Ct),
        bytes_accessed=(Bs * Cs + Bt * Ct) * itemsize + SUBLANES * LANES * 4,
    )

    out = pl.pallas_call(
        kernel,
        out_shape=jax.ShapeDtypeStruct((SUBLANES, LANES), jnp.float32),
        grid=(num_tiles,),
        in_specs=[
            # Clamp the block index so the shorter stream never requests a fully
            # out-of-bounds block; the in-kernel row mask zeroes its contribution.
            pl.BlockSpec((tile_b, Cs), lambda i: (jnp.minimum(i, nb_src - 1), 0)),
            pl.BlockSpec((tile_b, Ct), lambda i: (jnp.minimum(i, nb_tgt - 1), 0)),
        ],
        out_specs=pl.BlockSpec((SUBLANES, LANES), lambda i: (0, 0)),
        scratch_shapes=[
            pltpu.VMEM((SUBLANES, Cs), jnp.float32),
            pltpu.VMEM((SUBLANES, Ct), jnp.float32),
        ],
        compiler_params=pltpu.CompilerParams(dimension_semantics=("arbitrary",)),
        cost_estimate=cost,
    )(source, target)

    return out[0, 0]


def adda_loss_ref(source, target):
    """Plain-JAX reference mirroring the PyTorch module exactly."""
    return (
        -jnp.log(source[:, 0]).mean()
        - jnp.log(target[:, 0]).mean()
        - jnp.log(target[:, 1]).mean()
    )


def adda_loss(source: jax.Array, target: jax.Array) -> jax.Array:
    """Auto-dispatch: ADDA discriminators emit (B, 2) with small B; one fused XLA
    reduce beats a kernel launch until B is very large."""
    if max(source.shape[0], target.shape[0]) < 65536:
        return adda_loss_ref(source, target)
    return adda_loss_pallas(source, target)


if __name__ == "__main__":
    key = jax.random.PRNGKey(0)
    k1, k2, k3, k4 = jax.random.split(key, 4)

    # Test 1: small (B, 2) discriminator outputs, the module's actual usage.
    Bs, Bt, C = 8, 8, 2
    src_small = jax.random.uniform(k1, (Bs, C), jnp.float32, minval=0.05, maxval=0.95)
    tgt_small = jax.random.uniform(k2, (Bt, C), jnp.float32, minval=0.05, maxval=0.95)
    out_small = adda_loss_pallas(src_small, tgt_small)
    jax.block_until_ready(out_small)
    ref_small = adda_loss_ref(src_small, tgt_small)
    assert jnp.allclose(out_small, ref_small, rtol=1e-5, atol=1e-5), (out_small, ref_small)

    # Test 2: unequal batch sizes, C > 2, tiny tile to exercise the multi-tile
    # accumulator, ragged tails and the clamped index maps.
    Bs2, Bt2, C2 = 300, 260, 3
    src_big = jax.random.uniform(k3, (Bs2, C2), jnp.float32, minval=0.05, maxval=0.95)
    tgt_big = jax.random.uniform(k4, (Bt2, C2), jnp.float32, minval=0.05, maxval=0.95)
    out_big = adda_loss_pallas(src_big, tgt_big, tile_rows=64)
    jax.block_until_ready(out_big)
    ref_big = adda_loss_ref(src_big, tgt_big)
    assert jnp.allclose(out_big, ref_big, rtol=1e-4, atol=1e-4), (out_big, ref_big)

    print("KERNEL_OK")
</pallas_src>

<mosaic_0001>
module attributes {stable_mosaic.version = 11 : i64} {
  func.func @_adda_loss_kernel(%arg0: i32, %arg1: memref<8x2xf32, #tpu.memory_space<vmem>>, %arg2: memref<8x2xf32, #tpu.memory_space<vmem>>, %arg3: memref<8x128xf32, #tpu.memory_space<vmem>>, %arg4: memref<8x2xf32, #tpu.memory_space<vmem>>, %arg5: memref<8x2xf32, #tpu.memory_space<vmem>>) attributes {dimension_semantics = [#tpu.dimension_semantics<arbitrary>], iteration_bounds = array<i64: 1>, scalar_prefetch = 0 : i64, scratch_operands = 2 : i64, tpu.core_type = #tpu.core_type<tc>, window_params = [{transform_indices = @transform_0, window_bounds = array<i64: 8, 2>}, {transform_indices = @transform_1, window_bounds = array<i64: 8, 2>}, {pipeline_mode = #tpu.pipeline_mode<synchronous>, transform_indices = @transform_2, window_bounds = array<i64: 8, 128>}]} {
    %c0_i32 = arith.constant 0 : i32
    %0 = arith.cmpi eq, %arg0, %c0_i32 : i32
    %1 = arith.extui %0 : i1 to i32
    %c0_i32_0 = arith.constant 0 : i32
    %2 = arith.cmpi ne, %1, %c0_i32_0 : i32
    scf.if %2 {
      %cst_19 = arith.constant 0.000000e+00 : f32
      %36 = vector.broadcast %cst_19 : f32 to vector<8x2xf32>
      %c0_20 = arith.constant 0 : index
      %c0_21 = arith.constant 0 : index
      %37 = vector.load %arg4[%c0_20, %c0_21] : memref<8x2xf32, #tpu.memory_space<vmem>>, vector<8x2xf32>
      tpu.vector_store %arg4[%c0_20, %c0_21], %36 {strides = array<i32>} : memref<8x2xf32, #tpu.memory_space<vmem>>, vector<8x2xf32>,
      %cst_22 = arith.constant 0.000000e+00 : f32
      %38 = vector.broadcast %cst_22 : f32 to vector<8x2xf32>
      %c0_23 = arith.constant 0 : index
      %c0_24 = arith.constant 0 : index
      %39 = vector.load %arg5[%c0_23, %c0_24] : memref<8x2xf32, #tpu.memory_space<vmem>>, vector<8x2xf32>
      tpu.vector_store %arg5[%c0_23, %c0_24], %38 {strides = array<i32>} : memref<8x2xf32, #tpu.memory_space<vmem>>, vector<8x2xf32>,
    } else {
    }
    %c8_i32 = arith.constant 8 : i32
    %3 = arith.muli %arg0, %c8_i32 : i32
    %4 = tpu.iota {dimensions = array<i32: 0>} : vector<8x1xi32>
    %5 = vector.broadcast %3 : i32 to vector<8x1xi32>
    %6 = arith.addi %5, %4 : vector<8x1xi32>
    %c0 = arith.constant 0 : index
    %c0_1 = arith.constant 0 : index
    %7 = vector.load %arg1[%c0, %c0_1] : memref<8x2xf32, #tpu.memory_space<vmem>>, vector<8x2xf32>
    %c0_2 = arith.constant 0 : index
    %c0_3 = arith.constant 0 : index
    %8 = vector.load %arg2[%c0_2, %c0_3] : memref<8x2xf32, #tpu.memory_space<vmem>>, vector<8x2xf32>
    %c8_i32_4 = arith.constant 8 : i32
    %9 = vector.broadcast %c8_i32_4 : i32 to vector<8x1xi32>
    %10 = arith.cmpi slt, %6, %9 : vector<8x1xi32>
    %cst = arith.constant 1.000000e+00 : f32
    %11 = vector.shape_cast %10 : vector<8x1xi1> to vector<8x1xi1>
    %12 = vector.broadcast %11 : vector<8x1xi1> to vector<8x2xi1>
    %13 = vector.broadcast %cst : f32 to vector<8x2xf32>
    %14 = arith.select %12, %7, %13 : vector<8x2xi1>, vector<8x2xf32>
    %c8_i32_5 = arith.constant 8 : i32
    %15 = vector.broadcast %c8_i32_5 : i32 to vector<8x1xi32>
    %16 = arith.cmpi slt, %6, %15 : vector<8x1xi32>
    %cst_6 = arith.constant 1.000000e+00 : f32
    %17 = vector.shape_cast %16 : vector<8x1xi1> to vector<8x1xi1>
    %18 = vector.broadcast %17 : vector<8x1xi1> to vector<8x2xi1>
    %19 = vector.broadcast %cst_6 : f32 to vector<8x2xf32>
    %20 = arith.select %18, %8, %19 : vector<8x2xi1>, vector<8x2xf32>
    %c0_7 = arith.constant 0 : index
    %c0_8 = arith.constant 0 : index
    %21 = vector.load %arg4[%c0_7, %c0_8] : memref<8x2xf32, #tpu.memory_space<vmem>>, vector<8x2xf32>
    %22 = math.log %14 : vector<8x2xf32>
    %23 = vector.shape_cast %22 : vector<8x2xf32> to vector<1x8x2xf32>
    %cst_9 = arith.constant dense<0.000000e+00> : vector<8x2xf32>
    %24 = vector.multi_reduction <add>, %23, %cst_9 [0] : vector<1x8x2xf32> to vector<8x2xf32>
    %25 = arith.addf %21, %24 : vector<8x2xf32>
    %c0_10 = arith.constant 0 : index
    %c0_11 = arith.constant 0 : index
    %26 = vector.load %arg4[%c0_10, %c0_11] : memref<8x2xf32, #tpu.memory_space<vmem>>, vector<8x2xf32>
    tpu.vector_store %arg4[%c0_10, %c0_11], %25 {strides = array<i32>} : memref<8x2xf32, #tpu.memory_space<vmem>>, vector<8x2xf32>,
    %c0_12 = arith.constant 0 : index
    %c0_13 = arith.constant 0 : index
    %27 = vector.load %arg5[%c0_12, %c0_13] : memref<8x2xf32, #tpu.memory_space<vmem>>, vector<8x2xf32>
    %28 = math.log %20 : vector<8x2xf32>
    %29 = vector.shape_cast %28 : vector<8x2xf32> to vector<1x8x2xf32>
    %cst_14 = arith.constant dense<0.000000e+00> : vector<8x2xf32>
    %30 = vector.multi_reduction <add>, %29, %cst_14 [0] : vector<1x8x2xf32> to vector<8x2xf32>
    %31 = arith.addf %27, %30 : vector<8x2xf32>
    %c0_15 = arith.constant 0 : index
    %c0_16 = arith.constant 0 : index
    %32 = vector.load %arg5[%c0_15, %c0_16] : memref<8x2xf32, #tpu.memory_space<vmem>>, vector<8x2xf32>
    tpu.vector_store %arg5[%c0_15, %c0_16], %31 {strides = array<i32>} : memref<8x2xf32, #tpu.memory_space<vmem>>, vector<8x2xf32>,
    %c0_i32_17 = arith.constant 0 : i32
    %33 = arith.cmpi eq, %arg0, %c0_i32_17 : i32
    %34 = arith.extui %33 : i1 to i32
    %c0_i32_18 = arith.constant 0 : i32
    %35 = arith.cmpi ne, %34, %c0_i32_18 : i32
    scf.if %35 {
      %c0_19 = arith.constant 0 : index
      %c0_20 = arith.constant 0 : index
      %36 = vector.load %arg4[%c0_19, %c0_20] : memref<8x2xf32, #tpu.memory_space<vmem>>, vector<8x1xf32>
      %37 = vector.shape_cast %36 : vector<8x1xf32> to vector<1x8x1xf32>
      %cst_21 = arith.constant dense<0.000000e+00> : vector<1xf32>
      %38 = vector.multi_reduction <add>, %37, %cst_21 [1, 2] : vector<1x8x1xf32> to vector<1xf32>
      %39 = vector.shape_cast %38 : vector<1xf32> to vector<1x1x1xf32>
      %40 = vector.extract %39[0, 0, 0] : f32 from vector<1x1x1xf32>
      %c0_22 = arith.constant 0 : index
      %c0_23 = arith.constant 0 : index
      %41 = vector.load %arg5[%c0_22, %c0_23] : memref<8x2xf32, #tpu.memory_space<vmem>>, vector<8x1xf32>
      %42 = vector.shape_cast %41 : vector<8x1xf32> to vector<1x8x1xf32>
      %cst_24 = arith.constant dense<0.000000e+00> : vector<1xf32>
      %43 = vector.multi_reduction <add>, %42, %cst_24 [1, 2] : vector<1x8x1xf32> to vector<1xf32>
      %44 = vector.shape_cast %43 : vector<1xf32> to vector<1x1x1xf32>
      %45 = vector.extract %44[0, 0, 0] : f32 from vector<1x1x1xf32>
      %c0_25 = arith.constant 0 : index
      %c1 = arith.constant 1 : index
      %46 = vector.load %arg5[%c0_25, %c1] : memref<8x2xf32, #tpu.memory_space<vmem>>, vector<8x1xf32>
      %47 = vector.shape_cast %46 : vector<8x1xf32> to vector<1x8x1xf32>
      %cst_26 = arith.constant dense<0.000000e+00> : vector<1xf32>
      %48 = vector.multi_reduction <add>, %47, %cst_26 [1, 2] : vector<1x8x1xf32> to vector<1xf32>
      %49 = vector.shape_cast %48 : vector<1xf32> to vector<1x1x1xf32>
      %50 = vector.extract %49[0, 0, 0] : f32 from vector<1x1x1xf32>
      %51 = arith.addf %45, %50 : f32
      %cst_27 = arith.constant 1.250000e-01 : f32
      %52 = arith.mulf %40, %cst_27 : f32
      %cst_28 = arith.constant 1.250000e-01 : f32
      %53 = arith.mulf %51, %cst_28 : f32
      %54 = arith.addf %52, %53 : f32
      %cst_29 = arith.constant 0.000000e+00 : f32
      %55 = arith.subf %cst_29, %54 : f32
      %56 = vector.broadcast %55 : f32 to vector<8x128xf32>
      %c0_30 = arith.constant 0 : index
      %c0_31 = arith.constant 0 : index
      %57 = vector.load %arg3[%c0_30, %c0_31] : memref<8x128xf32, #tpu.memory_space<vmem>>, vector<8x128xf32>
      tpu.vector_store %arg3[%c0_30, %c0_31], %56 {strides = array<i32>} : memref<8x128xf32, #tpu.memory_space<vmem>>, vector<8x128xf32>,
    } else {
    }
    return
  }
  func.func @transform_0(%arg0: i32) -> (i32, i32) {
    %c0_i32 = arith.constant 0 : i32
    %0 = arith.minsi %arg0, %c0_i32 : i32
    %c0_i32_0 = arith.constant 0 : i32
    %c0_i32_1 = arith.constant 0 : i32
    return %0, %c0_i32_0 : i32, i32
  }
  func.func @transform_1(%arg0: i32) -> (i32, i32) {
    %c0_i32 = arith.constant 0 : i32
    %0 = arith.minsi %arg0, %c0_i32 : i32
    %c0_i32_0 = arith.constant 0 : i32
    %c0_i32_1 = arith.constant 0 : i32
    return %0, %c0_i32_0 : i32, i32
  }
  func.func @transform_2(%arg0: i32) -> (i32, i32) {
    %c0_i32 = arith.constant 0 : i32
    %c0_i32_0 = arith.constant 0 : i32
    %c0_i32_1 = arith.constant 0 : i32
    return %c0_i32, %c0_i32_0 : i32, i32
  }
}

</mosaic_0001>

<bundles_post_ra>
// kernel: tpu_custom_call.1
= control target key start
LH: loop header
LB: loop body
LE: loop exit
PB: predicated region body
PF: predicated region fallthrough
CT: control target
= control target key end

     0   :  { %vm16_vm0 = vcmask 15360   ;;  %v146_v2 = vmov 0.0   ;;  %s177_s0 = inlined_call_operand.vmem [shape: f32[8,2], index: 0, kind: input, shape index: {}]   ;;  %s178_s1 = inlined_call_operand.vmem [shape: f32[8,2], index: 1, kind: input, shape index: {}]   ;;  %s179_s2 = inlined_call_operand.hbm [shape: f32[8,128], index: 2, kind: output, shape index: {}]  }
   0x1   :  { %v25_v0 = vld [vmem:[%s178_s1] sm:$0xff]  ;;  %18 = vst.msk [vmem:[#allocation3] sm:$0xff] %vm16_vm0, %v146_v2 }
   0x2   :  { %v24_v1 = vld [vmem:[%s177_s0] sm:$0xff]  ;;  %116 = vlog2.f32 %v25_v0 }
   0x3   :  { %7 = vsyncpa [#allocation5], 0  ;;  %17 = vst.msk [vmem:[#allocation2] sm:$0xff] %vm16_vm0, %v146_v2  ;;  %118 = vlog2.f32 %v24_v1  ;;  %vm48_vm1 = vcmask 7168   ;;  %s147_s0 = smov 127   ;;  %s148_s18 = smov [#allocation4]  }
   0x4   :  { %s96_s19 = sshll.u32 %s148_s18, 4  ;;  %s98_s23 = sshll.u32 %s179_s2, 4  ;;  %s97_s19 = int_to_ptr.vmem [resolvable:$true] %s96_s19  ;;  %s99_s23 = int_to_ptr.hbm [resolvable:$true] %s98_s23 }
   0x8   :  { %v117_v3 = vpop.eup %116  ;;  %v38_v5 = vld [vmem:[#allocation3] sm:$0xff] }
   0x9   :  { %v119_v4 = vpop.eup %118  ;;  %v40_v6 = vmul.f32 0.6931472, %v117_v3 }
   0xa   :  { %v31_v7 = vld [vmem:[#allocation2] sm:$0xff]  ;;  %v33_v8 = vmul.f32 0.6931472, %v119_v4 }
   0xb   :  { %v42_v9 = vadd.f32 %v40_v6, %v38_v5 }
   0xc   :  { %v35_v10 = vadd.f32 %v33_v8, %v31_v7 }
   0xd   :  { %43 = vst.msk [vmem:[#allocation3] sm:$0xff] %vm16_vm0, %v42_v9 }
   0xe   :  { %37 = vst.msk [vmem:[#allocation2] sm:$0xff] %vm16_vm0, %v35_v10 }
  0x14   :  { %v59_v11 = vld [vmem:[#allocation3] sm:$0xff] }
  0x15   :  { %71 = vrot.lane.b32.xlu0 %v59_v11, %s147_s0  ;;  %v60_v12 = vsel %vm48_vm1, %v59_v11, 0.0  ;;  %v47_v13 = vld [vmem:[#allocation2] sm:$0xff] }
  0x16   :  { %61 = vadd.xlane.f32.xlu1 %v60_v12  ;;  %v49_v14 = vsel %vm48_vm1, %v47_v13, 0.0 }
  0x3f   :  { %50 = vadd.xlane.f32.xlu0 %v49_v14 }
  0x87   :  { %v72_v15 = vpop.permute.xlu0 %71 }
  0x88   :  { %v74_v16 = vsel %vm48_vm1, %v72_v15, 0.0 }
  0x89   :  { %75 = vadd.xlane.f32.xlu1 %v74_v16  ;;  %v62_v17 = vpop.xlane.xlu1 %61 }
  0x8a   :  { %v63_v18 = vrot.slane %v62_v17, 4 }
  0x8c   :  { %v64_v19 = vadd.f32 %v63_v18, %v62_v17 }
  0x8e   :  { %v65_v20 = vrot.slane %v64_v19, 2 }
  0x90   :  { %v66_v23 = vadd.f32 %v65_v20, %v64_v19 }
  0x92   :  { %v67_v26 = vrot.slane %v66_v23, 1 }
  0x94   :  { %v68_v29 = vadd.f32 %v67_v26, %v66_v23 }
  0xb2   :  { %v51_v21 = vpop.xlane.xlu0 %50 }
  0xb3   :  { %v52_v22 = vrot.slane %v51_v21, 4 }
  0xb5   :  { %v53_v24 = vadd.f32 %v52_v22, %v51_v21 }
  0xb7   :  { %v54_v25 = vrot.slane %v53_v24, 2 }
  0xb9   :  { %v55_v27 = vadd.f32 %v54_v25, %v53_v24 }
  0xbb   :  { %v56_v28 = vrot.slane %v55_v27, 1 }
  0xbd   :  { %v57_v30 = vadd.f32 %v56_v28, %v55_v27 }
  0xbf   :  { %107 = vpush %v57_v30 }
  0xc0   :  { %109 = vpush %v68_v29 }
  0xf0   :  { %s108_s1 = spop %107 }
  0xf1   :  { %s110_s13 = spop %109  ;;  %s85_s16 = smul.f32 0.125, %s108_s1 }
  0xfc   :  { %v76_v31 = vpop.xlane.xlu1 %75 }
  0xfd   :  { %v77_v32 = vrot.slane %v76_v31, 4 }
  0xff   :  { %v78_v33 = vadd.f32 %v77_v32, %v76_v31 }
 0x101   :  { %v79_v34 = vrot.slane %v78_v33, 2 }
 0x103   :  { %v80_v35 = vadd.f32 %v79_v34, %v78_v33 }
 0x105   :  { %v81_v36 = vrot.slane %v80_v35, 1 }
 0x107   :  { %v82_v37 = vadd.f32 %v81_v36, %v80_v35 }
 0x109   :  { %111 = vpush %v82_v37 }
 0x13a   :  { %s112_s14 = spop %111 }
 0x13b   :  { %s84_s15 = sadd.f32 %s112_s14, %s110_s13 }
 0x13d   :  { %s86_s17 = smul.f32 0.125, %s84_s15 }
 0x13f   :  { %s87_s20 = sadd.f32 %s86_s17, %s85_s16 }
 0x141   :  { %s88_s24 = ssub.f32 0.0, %s87_s20 }
 0x143   :  { %v89_v38 = vstv %s88_s24 }
 0x144   :  { %90 = vst [vmem:[#allocation4] sm:$0xff] %v89_v38 }
 0x145   :  { %101 = dma.vmem_to_hbm [thread:$0]  %s97_s19, 128, %s99_s23, [#allocation5]  }
 0x146   :  { %144 = dma.done.wait [#allocation5], 128  }
 0x147   :  { %145 = vsyncadd [#allocation5], 4294967168 }
 0x148   :  { %106 = vsyncpa [#allocation5], 1 }

</bundles_post_ra>
